<compile_context>
chip_gen: v7x
topology: tpu7x:2x2x1
jax: 0.10.0
libtpu: 0.0.40
codegen_flags: <defaults>
</compile_context>

<pallas_src>
import math
import jax
import jax.numpy as jnp
from jax import lax
from jax.experimental import pallas as pl
from jax.experimental.pallas import tpu as pltpu

MIN_NORM = 1e-15
EPS_F32 = 4e-3          # PoincareBall.eps[torch.float32]
ATANH_CLAMP = 1.0 - 1e-7


def _round_up(v: int, m: int) -> int:
    return (v + m - 1) // m * m


def _make_kernel(c: float, use_bias: bool):
    sqrt_c = math.sqrt(c)
    maxnorm = (1.0 - EPS_F32) / sqrt_c

    def kernel(x_ref, w_ref, hb_ref, o_ref):
        x = x_ref[...].astype(jnp.float32)          # (tm, in_p)
        w = w_ref[...].astype(jnp.float32)          # (out_p, in_p)

        # ---- mobius_matvec(W, x, c), with the scale + proj folded to per-row scalars ----
        x_sq = jnp.sum(x * x, axis=-1, keepdims=True)                 # (tm, 1)
        x_norm = jnp.maximum(jnp.sqrt(x_sq), MIN_NORM)

        # mx = x @ W^T  (contract in_features of both operands; MXU matmul, f32 accumulate)
        mx = lax.dot_general(
            x, w, dimension_numbers=(((1,), (1,)), ((), ())),
            preferred_element_type=jnp.float32)                        # (tm, out_p)

        mx_sq = jnp.sum(mx * mx, axis=-1, keepdims=True)               # (tm, 1)
        all_zero = mx_sq == 0.0
        mx_norm = jnp.maximum(jnp.sqrt(mx_sq), MIN_NORM)

        # Artanh with clamped argument (matches HGCN's saturating Artanh, no inf/NaN)
        z = jnp.minimum(sqrt_c * x_norm, ATANH_CLAMP)
        atanh_z = 0.5 * jnp.log((1.0 + z) / (1.0 - z))

        # res = tanh(mx_norm/x_norm * atanh(sqrt_c*x_norm)) * mx / (mx_norm*sqrt_c)
        # followed by proj (clip norm to maxnorm).  Since res = factor * mx with
        # factor >= 0 and ||res|| = factor * mx_norm, the clip is just
        # factor = min(factor, maxnorm / mx_norm).  All of this is (tm, 1) work.
        factor = jnp.tanh(mx_norm / x_norm * atanh_z) / (mx_norm * sqrt_c)
        factor = jnp.minimum(factor, maxnorm / mx_norm)
        factor = jnp.where(all_zero, 0.0, factor)

        res = factor * mx                                              # one broadcast multiply

        if use_bias:
            # hb is already proj(expmap0(proj_tan0(bias))) - computed once in the wrapper.
            hb = hb_ref[...].astype(jnp.float32)                       # (1, out_p)

            # ---- mobius_add(res, hyp_bias, c) ----
            x2 = (factor * factor) * mx_sq                             # == sum(res*res), (tm,1)
            y2 = jnp.sum(hb * hb, axis=-1, keepdims=True)              # (1, 1)
            xy = jnp.sum(res * hb, axis=-1, keepdims=True)             # (tm, 1)

            num = (1.0 + 2.0 * c * xy + c * y2) * res + (1.0 - c * x2) * hb
            den = jnp.maximum(1.0 + 2.0 * c * xy + c * c * x2 * y2, MIN_NORM)
            inv_den = 1.0 / den                                        # (tm, 1) - cheap
            out = num * inv_den

            # ---- final proj, again as a per-row scalar scale ----
            n = jnp.maximum(
                jnp.sqrt(jnp.sum(out * out, axis=-1, keepdims=True)), MIN_NORM)
            scale = jnp.minimum(maxnorm / n, 1.0)                      # (tm, 1) - cheap
            out = out * scale
        else:
            out = res

        o_ref[...] = out.astype(o_ref.dtype)

    return kernel


def hyp_linear(x, weight, bias, *, c: float, use_bias: bool = True, tm: int = 256):
    """Pallas TPU HypLinear forward (eval mode: dropout on weight is identity).

    x: (N, in_features) float32 (any N)
    weight: (out_features, in_features)
    bias: (out_features,)
    returns: (N, out_features)
    """
    # TODO(synk): training-mode dropout on the weight (F.dropout) is not applied;
    # eval-mode forward is implemented (dropout == identity).
    N, in_f = x.shape
    out_f, in_f2 = weight.shape
    assert in_f == in_f2

    sqrt_c = math.sqrt(c)
    maxnorm = (1.0 - EPS_F32) / sqrt_c

    # ---- lane/sublane-friendly padding (zero padding is norm-neutral) ----
    in_p = _round_up(in_f, 128)
    out_p = _round_up(out_f, 128)
    tm_eff = min(tm, _round_up(N, 8))        # multiple of 8, don't over-tile small N
    n_p = _round_up(N, tm_eff)

    x_p = jnp.zeros((n_p, in_p), jnp.float32).at[:N, :in_f].set(
        x.astype(jnp.float32))
    w_p = jnp.zeros((out_p, in_p), jnp.float32).at[:out_f, :in_f].set(
        weight.astype(jnp.float32))

    # ---- hoist the grid-invariant hyperbolic bias transform into the wrapper ----
    if use_bias:
        u = bias.astype(jnp.float32).reshape(1, out_f)   # proj_tan0 == identity
        u_norm = jnp.maximum(jnp.linalg.norm(u, axis=-1, keepdims=True), MIN_NORM)
        hb = jnp.tanh(sqrt_c * u_norm) * u / (sqrt_c * u_norm)          # expmap0
        hbn = jnp.maximum(jnp.linalg.norm(hb, axis=-1, keepdims=True), MIN_NORM)
        hb = jnp.where(hbn > maxnorm, hb / hbn * maxnorm, hb)           # proj
    else:
        hb = jnp.zeros((1, out_f), jnp.float32)
    hb_p = jnp.zeros((1, out_p), jnp.float32).at[:, :out_f].set(hb)

    # ---- explicit VMEM budget: x/out tiles double-buffered + full weight + bias ----
    vmem_bytes = 4 * (2 * tm_eff * (in_p + out_p) + 2 * out_p * in_p + 2 * out_p)
    vmem_limit = int(min(max(vmem_bytes + (2 << 20), 16 << 20), 112 << 20))

    kernel = _make_kernel(c, use_bias)

    out_padded = pl.pallas_call(
        kernel,
        out_shape=jax.ShapeDtypeStruct((n_p, out_p), x.dtype),
        grid_spec=pltpu.PrefetchScalarGridSpec(
            num_scalar_prefetch=0,
            grid=(n_p // tm_eff,),
            in_specs=[
                pl.BlockSpec((tm_eff, in_p), lambda i: (i, 0)),    # x row tile
                pl.BlockSpec((out_p, in_p), lambda i: (0, 0)),     # full weight (invariant)
                pl.BlockSpec((1, out_p), lambda i: (0, 0)),        # hyperbolic bias (invariant)
            ],
            out_specs=pl.BlockSpec((tm_eff, out_p), lambda i: (i, 0)),
        ),
        compiler_params=pltpu.CompilerParams(
            dimension_semantics=("parallel",),
            vmem_limit_bytes=vmem_limit),
    )(x_p, w_p, hb_p)

    return out_padded[:N, :out_f]


def hyp_linear_ref(x, weight, bias, *, c: float, use_bias: bool = True):
    """Pure-JAX reference for correctness checking (faithful to the PyTorch module)."""
    sqrt_c = math.sqrt(c)
    maxnorm = (1.0 - EPS_F32) / sqrt_c

    def proj(y):
        n = jnp.maximum(jnp.linalg.norm(y, axis=-1, keepdims=True), MIN_NORM)
        return jnp.where(n > maxnorm, y / n * maxnorm, y)

    x_norm = jnp.maximum(jnp.linalg.norm(x, axis=-1, keepdims=True), MIN_NORM)
    mx = x @ weight.T
    mx_norm = jnp.maximum(jnp.linalg.norm(mx, axis=-1, keepdims=True), MIN_NORM)
    atanh_arg = jnp.minimum(sqrt_c * x_norm, ATANH_CLAMP)
    res_c = (jnp.tanh(mx_norm / x_norm * jnp.arctanh(atanh_arg))
             * mx / (mx_norm * sqrt_c))
    res = jnp.where(jnp.all(mx == 0.0, axis=-1, keepdims=True), 0.0, res_c)
    res = proj(res)
    if use_bias:
        u = bias.reshape(1, -1)
        u_norm = jnp.maximum(jnp.linalg.norm(u, axis=-1, keepdims=True), MIN_NORM)
        hb = proj(jnp.tanh(sqrt_c * u_norm) * u / (sqrt_c * u_norm))
        x2 = jnp.sum(res * res, -1, keepdims=True)
        y2 = jnp.sum(hb * hb, -1, keepdims=True)
        xy = jnp.sum(res * hb, -1, keepdims=True)
        num = (1 + 2 * c * xy + c * y2) * res + (1 - c * x2) * hb
        den = jnp.maximum(1 + 2 * c * xy + c * c * x2 * y2, MIN_NORM)
        res = proj(num / den)
    return res


if __name__ == "__main__":
    N, in_features, out_features = 16, 32, 16
    c = 1.0

    key = jax.random.PRNGKey(0)
    kx, kw, kb = jax.random.split(key, 3)

    # Input points inside the Poincare ball (small norm so atanh is well defined).
    x = 0.05 * jax.random.normal(kx, (N, in_features), dtype=jnp.float32)

    # Xavier-uniform-like weight init (gain sqrt(2)), deterministic; bias small nonzero
    # to exercise the mobius_add bias path (reset_parameters sets bias=0, which is trivial).
    bound = math.sqrt(2.0) * math.sqrt(6.0 / (in_features + out_features))
    weight = jax.random.uniform(
        kw, (out_features, in_features), minval=-bound, maxval=bound,
        dtype=jnp.float32)
    bias = 0.01 * jax.random.normal(kb, (out_features,), dtype=jnp.float32)

    out = hyp_linear(x, weight, bias, c=c, use_bias=True)
    out = jax.block_until_ready(out)

    ref = hyp_linear_ref(x, weight, bias, c=c, use_bias=True)
    assert out.shape == (N, out_features)
    assert bool(jnp.all(jnp.isfinite(out)))
    assert bool(jnp.allclose(out, ref, atol=1e-5, rtol=1e-5)), \
        f"max abs err {float(jnp.max(jnp.abs(out - ref)))}"

    print("KERNEL_OK")
</pallas_src>

<mosaic_0001>
module attributes {stable_mosaic.version = 11 : i64} {
  func.func @kernel(%arg0: i32, %arg1: memref<16x128xf32, #tpu.memory_space<vmem>>, %arg2: memref<128x128xf32, #tpu.memory_space<vmem>>, %arg3: memref<1x128xf32, #tpu.memory_space<vmem>>, %arg4: memref<16x128xf32, #tpu.memory_space<vmem>>) attributes {dimension_semantics = [#tpu.dimension_semantics<parallel>], iteration_bounds = array<i64: 1>, scalar_prefetch = 0 : i64, scratch_operands = 0 : i64, tpu.core_type = #tpu.core_type<tc>, window_params = [{transform_indices = @transform_0, window_bounds = array<i64: 16, 128>}, {pipeline_mode = #tpu.pipeline_mode<synchronous>, transform_indices = @transform_1, window_bounds = array<i64: 128, 128>}, {pipeline_mode = #tpu.pipeline_mode<synchronous>, transform_indices = @transform_2, window_bounds = array<i64: 1, 128>}, {transform_indices = @transform_3, window_bounds = array<i64: 16, 128>}]} {
    %c0 = arith.constant 0 : index
    %c0_0 = arith.constant 0 : index
    %0 = vector.load %arg1[%c0, %c0_0] : memref<16x128xf32, #tpu.memory_space<vmem>>, vector<16x128xf32>
    %c0_1 = arith.constant 0 : index
    %c0_2 = arith.constant 0 : index
    %1 = vector.load %arg2[%c0_1, %c0_2] : memref<128x128xf32, #tpu.memory_space<vmem>>, vector<128x128xf32>
    %2 = arith.mulf %0, %0 : vector<16x128xf32>
    %cst = arith.constant dense<0.000000e+00> : vector<16xf32>
    %3 = vector.multi_reduction <add>, %2, %cst [1] : vector<16x128xf32> to vector<16xf32>
    %4 = vector.shape_cast %3 : vector<16xf32> to vector<16x1xf32>
    %5 = math.sqrt %4 : vector<16x1xf32>
    %cst_3 = arith.constant 1.000000e-15 : f32
    %6 = vector.broadcast %cst_3 : f32 to vector<16x1xf32>
    %7 = arith.maximumf %5, %6 : vector<16x1xf32>
    %cst_4 = arith.constant dense<0.000000e+00> : vector<16x128xf32>
    %8 = tpu.matmul %0, %1, %cst_4 {dimension_numbers = #tpu.dot_dimension_numbers<[1], [1], [0], [0], [0, 0, 1, 0], [], []>} : vector<16x128xf32>, vector<128x128xf32>, vector<16x128xf32> -> vector<16x128xf32>
    %9 = arith.mulf %8, %8 : vector<16x128xf32>
    %cst_5 = arith.constant dense<0.000000e+00> : vector<16xf32>
    %10 = vector.multi_reduction <add>, %9, %cst_5 [1] : vector<16x128xf32> to vector<16xf32>
    %11 = vector.shape_cast %10 : vector<16xf32> to vector<16x1xf32>
    %cst_6 = arith.constant 0.000000e+00 : f32
    %12 = vector.broadcast %cst_6 : f32 to vector<16x1xf32>
    %13 = arith.cmpf oeq, %11, %12 : vector<16x1xf32>
    %14 = math.sqrt %11 : vector<16x1xf32>
    %cst_7 = arith.constant 1.000000e-15 : f32
    %15 = vector.broadcast %cst_7 : f32 to vector<16x1xf32>
    %16 = arith.maximumf %14, %15 : vector<16x1xf32>
    %cst_8 = arith.constant 1.000000e+00 : f32
    %17 = vector.broadcast %cst_8 : f32 to vector<16x1xf32>
    %18 = arith.mulf %17, %7 : vector<16x1xf32>
    %cst_9 = arith.constant 0.99999988 : f32
    %19 = vector.broadcast %cst_9 : f32 to vector<16x1xf32>
    %20 = arith.minimumf %18, %19 : vector<16x1xf32>
    %cst_10 = arith.constant 1.000000e+00 : f32
    %21 = vector.broadcast %cst_10 : f32 to vector<16x1xf32>
    %22 = arith.addf %21, %20 : vector<16x1xf32>
    %cst_11 = arith.constant 1.000000e+00 : f32
    %23 = vector.broadcast %cst_11 : f32 to vector<16x1xf32>
    %24 = arith.subf %23, %20 : vector<16x1xf32>
    %25 = arith.divf %22, %24 : vector<16x1xf32>
    %26 = math.log %25 : vector<16x1xf32>
    %cst_12 = arith.constant 5.000000e-01 : f32
    %27 = vector.broadcast %cst_12 : f32 to vector<16x1xf32>
    %28 = arith.mulf %27, %26 : vector<16x1xf32>
    %29 = arith.divf %16, %7 : vector<16x1xf32>
    %30 = arith.mulf %29, %28 : vector<16x1xf32>
    %31 = math.tanh %30 : vector<16x1xf32>
    %cst_13 = arith.constant 1.000000e+00 : f32
    %32 = vector.broadcast %cst_13 : f32 to vector<16x1xf32>
    %33 = arith.mulf %16, %32 : vector<16x1xf32>
    %34 = arith.divf %31, %33 : vector<16x1xf32>
    %cst_14 = arith.constant 0.995999991 : f32
    %35 = vector.broadcast %cst_14 : f32 to vector<16x1xf32>
    %36 = arith.divf %35, %16 : vector<16x1xf32>
    %37 = arith.minimumf %34, %36 : vector<16x1xf32>
    %cst_15 = arith.constant 0.000000e+00 : f32
    %38 = vector.broadcast %cst_15 : f32 to vector<16x1xf32>
    %39 = arith.select %13, %38, %37 : vector<16x1xi1>, vector<16x1xf32>
    %40 = vector.broadcast %39 : vector<16x1xf32> to vector<16x128xf32>
    %41 = arith.mulf %40, %8 : vector<16x128xf32>
    %c0_16 = arith.constant 0 : index
    %c0_17 = arith.constant 0 : index
    %42 = vector.load %arg3[%c0_16, %c0_17] : memref<1x128xf32, #tpu.memory_space<vmem>>, vector<1x128xf32>
    %43 = arith.mulf %39, %39 : vector<16x1xf32>
    %44 = arith.mulf %43, %11 : vector<16x1xf32>
    %45 = arith.mulf %42, %42 : vector<1x128xf32>
    %cst_18 = arith.constant dense<0.000000e+00> : vector<1xf32>
    %46 = vector.multi_reduction <add>, %45, %cst_18 [1] : vector<1x128xf32> to vector<1xf32>
    %47 = vector.shape_cast %46 : vector<1xf32> to vector<1x1xf32>
    %48 = vector.broadcast %42 : vector<1x128xf32> to vector<16x128xf32>
    %49 = arith.mulf %41, %48 : vector<16x128xf32>
    %cst_19 = arith.constant dense<0.000000e+00> : vector<16xf32>
    %50 = vector.multi_reduction <add>, %49, %cst_19 [1] : vector<16x128xf32> to vector<16xf32>
    %51 = vector.shape_cast %50 : vector<16xf32> to vector<16x1xf32>
    %cst_20 = arith.constant 2.000000e+00 : f32
    %52 = vector.broadcast %cst_20 : f32 to vector<16x1xf32>
    %53 = arith.mulf %52, %51 : vector<16x1xf32>
    %cst_21 = arith.constant 1.000000e+00 : f32
    %54 = vector.broadcast %cst_21 : f32 to vector<16x1xf32>
    %55 = arith.addf %54, %53 : vector<16x1xf32>
    %cst_22 = arith.constant 1.000000e+00 : f32
    %56 = vector.broadcast %cst_22 : f32 to vector<1x1xf32>
    %57 = arith.mulf %56, %47 : vector<1x1xf32>
    %58 = vector.broadcast %57 : vector<1x1xf32> to vector<16x1xf32>
    %59 = arith.addf %55, %58 : vector<16x1xf32>
    %60 = vector.broadcast %59 : vector<16x1xf32> to vector<16x128xf32>
    %61 = arith.mulf %60, %41 : vector<16x128xf32>
    %cst_23 = arith.constant 1.000000e+00 : f32
    %62 = vector.broadcast %cst_23 : f32 to vector<16x1xf32>
    %63 = arith.mulf %62, %44 : vector<16x1xf32>
    %cst_24 = arith.constant 1.000000e+00 : f32
    %64 = vector.broadcast %cst_24 : f32 to vector<16x1xf32>
    %65 = arith.subf %64, %63 : vector<16x1xf32>
    %66 = vector.broadcast %65 : vector<16x1xf32> to vector<16x128xf32>
    %67 = vector.broadcast %42 : vector<1x128xf32> to vector<16x128xf32>
    %68 = arith.mulf %66, %67 : vector<16x128xf32>
    %69 = arith.addf %61, %68 : vector<16x128xf32>
    %cst_25 = arith.constant 2.000000e+00 : f32
    %70 = vector.broadcast %cst_25 : f32 to vector<16x1xf32>
    %71 = arith.mulf %70, %51 : vector<16x1xf32>
    %cst_26 = arith.constant 1.000000e+00 : f32
    %72 = vector.broadcast %cst_26 : f32 to vector<16x1xf32>
    %73 = arith.addf %72, %71 : vector<16x1xf32>
    %cst_27 = arith.constant 1.000000e+00 : f32
    %74 = vector.broadcast %cst_27 : f32 to vector<16x1xf32>
    %75 = arith.mulf %74, %44 : vector<16x1xf32>
    %76 = vector.broadcast %47 : vector<1x1xf32> to vector<16x1xf32>
    %77 = arith.mulf %75, %76 : vector<16x1xf32>
    %78 = arith.addf %73, %77 : vector<16x1xf32>
    %cst_28 = arith.constant 1.000000e-15 : f32
    %79 = vector.broadcast %cst_28 : f32 to vector<16x1xf32>
    %80 = arith.maximumf %78, %79 : vector<16x1xf32>
    %cst_29 = arith.constant 1.000000e+00 : f32
    %81 = vector.broadcast %cst_29 : f32 to vector<16x1xf32>
    %82 = arith.divf %81, %80 : vector<16x1xf32>
    %83 = vector.broadcast %82 : vector<16x1xf32> to vector<16x128xf32>
    %84 = arith.mulf %69, %83 : vector<16x128xf32>
    %85 = arith.mulf %84, %84 : vector<16x128xf32>
    %cst_30 = arith.constant dense<0.000000e+00> : vector<16xf32>
    %86 = vector.multi_reduction <add>, %85, %cst_30 [1] : vector<16x128xf32> to vector<16xf32>
    %87 = vector.shape_cast %86 : vector<16xf32> to vector<16x1xf32>
    %88 = math.sqrt %87 : vector<16x1xf32>
    %cst_31 = arith.constant 1.000000e-15 : f32
    %89 = vector.broadcast %cst_31 : f32 to vector<16x1xf32>
    %90 = arith.maximumf %88, %89 : vector<16x1xf32>
    %cst_32 = arith.constant 0.995999991 : f32
    %91 = vector.broadcast %cst_32 : f32 to vector<16x1xf32>
    %92 = arith.divf %91, %90 : vector<16x1xf32>
    %cst_33 = arith.constant 1.000000e+00 : f32
    %93 = vector.broadcast %cst_33 : f32 to vector<16x1xf32>
    %94 = arith.minimumf %92, %93 : vector<16x1xf32>
    %95 = vector.broadcast %94 : vector<16x1xf32> to vector<16x128xf32>
    %96 = arith.mulf %84, %95 : vector<16x128xf32>
    %c0_34 = arith.constant 0 : index
    %c0_35 = arith.constant 0 : index
    %97 = vector.load %arg4[%c0_34, %c0_35] : memref<16x128xf32, #tpu.memory_space<vmem>>, vector<16x128xf32>
    tpu.vector_store %arg4[%c0_34, %c0_35], %96 {strides = array<i32>} : memref<16x128xf32, #tpu.memory_space<vmem>>, vector<16x128xf32>,
    return
  }
  func.func @transform_0(%arg0: i32) -> (i32, i32) {
    %c0_i32 = arith.constant 0 : i32
    %c0_i32_0 = arith.constant 0 : i32
    return %arg0, %c0_i32 : i32, i32
  }
  func.func @transform_1(%arg0: i32) -> (i32, i32) {
    %c0_i32 = arith.constant 0 : i32
    %c0_i32_0 = arith.constant 0 : i32
    %c0_i32_1 = arith.constant 0 : i32
    return %c0_i32, %c0_i32_0 : i32, i32
  }
  func.func @transform_2(%arg0: i32) -> (i32, i32) {
    %c0_i32 = arith.constant 0 : i32
    %c0_i32_0 = arith.constant 0 : i32
    %c0_i32_1 = arith.constant 0 : i32
    return %c0_i32, %c0_i32_0 : i32, i32
  }
  func.func @transform_3(%arg0: i32) -> (i32, i32) {
    %c0_i32 = arith.constant 0 : i32
    %c0_i32_0 = arith.constant 0 : i32
    return %arg0, %c0_i32 : i32, i32
  }
}

</mosaic_0001>

<bundles_post_ra>
// kernel: tpu_custom_call.1
= control target key start
LH: loop header
LB: loop body
LE: loop exit
PB: predicated region body
PF: predicated region fallthrough
CT: control target
= control target key end

     0   :  { %8 = vsyncpa [#allocation3], 0  ;;  %s625_s0 = inlined_call_operand.hbm [shape: f32[16,128], index: 0, kind: input, shape index: {}]   ;;  %s626_s1 = inlined_call_operand.hbm [shape: f32[128,128], index: 1, kind: input, shape index: {}]   ;;  %s627_s2 = inlined_call_operand.vmem [shape: f32[1,128], index: 2, kind: input, shape index: {}]   ;;  %s628_s3 = inlined_call_operand.hbm [shape: f32[16,128], index: 3, kind: output, shape index: {}]  }
   0x1   :  { %9 = vsyncpa [#allocation6], 0 }
   0x2   :  { %10 = vsyncpa [#allocation4], 0  ;;  %s522_s12 = smov [#allocation2]   ;;  %s450_s16 = scalar_lea.hbm %s625_s0, 256 }
   0x3   :  { %s16_s13 = sshll.u32 %s522_s12, 4  ;;  %p451_p0 = scmp.ne.s32.totalorder %s625_s0, %s450_s16  ;;  %s17_s13 = int_to_ptr.vmem [resolvable:$true] %s16_s13 }
   0x4   :  { %p454_p1 = scmp.lt.u32.totalorder %s450_s16, %s625_s0 }
   0x6   :  { %p456_p2 = pnand %p454_p1, %p451_p0 }
   0x8   :  { %459 = shalt.err (!%p456_p2)
}
   0x9   :  { %s460_s21 = scalar_lea.vmem %s17_s13, 256  ;;  %p465_p4 = scmp.lt.s32.totalorder %s17_s13, %s17_s13 }
   0xa   :  { %p461_p3 = scmp.ne.s32.totalorder %s17_s13, %s460_s21  ;;  %p466_p5 = scmp.lt.s32.totalorder %s460_s21, %s460_s21 }
   0xc   :  { %p467_p6 = por %p466_p5, %p465_p4 }
   0xe   :  { %p468_p7 = pnand %p467_p6, %p461_p3 }
  0x10   :  { %471 = shalt.err (!%p468_p7)
}
  0x11   :  { %s523_s22 = smov 128   ;;  %s524_s23 = smov 8  }
  0x12   :  { %22 = dma.hbm_to_vmem [thread:$0]  %s625_s0, 256, %s17_s13, [#allocation3], %s523_s22, %s523_s22, %s524_s23  }
  0x13   :  { %s525_s26 = smov [#allocation5]   ;;  %s472_s30 = scalar_lea.hbm %s626_s1, 2048 }
  0x14   :  { %s28_s27 = sshll.u32 %s525_s26, 4  ;;  %p473_p8 = scmp.ne.s32.totalorder %s626_s1, %s472_s30  ;;  %s29_s27 = int_to_ptr.vmem [resolvable:$true] %s28_s27 }
  0x15   :  { %p476_p9 = scmp.lt.u32.totalorder %s472_s30, %s626_s1 }
  0x17   :  { %p478_p10 = pnand %p476_p9, %p473_p8 }
  0x19   :  { %481 = shalt.err (!%p478_p10)
}
  0x1a   :  { %s482_s8 = scalar_lea.vmem %s29_s27, 2048  ;;  %p487_p12 = scmp.lt.s32.totalorder %s29_s27, %s29_s27 }
  0x1b   :  { %p483_p11 = scmp.ne.s32.totalorder %s29_s27, %s482_s8  ;;  %p488_p13 = scmp.lt.s32.totalorder %s482_s8, %s482_s8 }
  0x1d   :  { %p489_p0 = por %p488_p13, %p487_p12 }
  0x1f   :  { %p490_p1 = pnand %p489_p0, %p483_p11 }
  0x21   :  { %493 = shalt.err (!%p490_p1)
}
  0x22   :  { %34 = dma.hbm_to_vmem [thread:$0]  %s626_s1, 2048, %s29_s27, [#allocation6], %s523_s22, %s523_s22, %s524_s23  }
  0x23   :  { %516 = dma.done.wait [#allocation3], 256  }
  0x24   :  { %517 = vsyncadd [#allocation3], 4294967040 }
  0x25   :  { %518 = dma.done.wait [#allocation6], 2048  }
  0x26   :  { %519 = vsyncadd [#allocation6], 4294965248  ;;  %v45_v0 = vld [vmem:[#allocation5] sm:$0xff]  ;;  %v46_v1 = vld [vmem:[#allocation5 + $0x8] sm:$0xff]  ;;  %vm224_vm0 = vcmask 1040384  }
  0x27   :  { %v47_v2 = vld [vmem:[#allocation5 + $0x10] sm:$0xff]  ;;  %v373_v3 = vpack.c.bf16 %v46_v1, %v45_v0  ;;  %v48_v4 = vld [vmem:[#allocation5 + $0x18] sm:$0xff]  ;;  %v49_v7 = vld [vmem:[#allocation5 + $0x20] sm:$0xff] }
  0x28   :  { %v377_v5 = vpack.c.bf16 %v48_v4, %v47_v2  ;;  %v43_v6 = vld [vmem:[#allocation2] sm:$0xff]  ;;  %v50_v8 = vld [vmem:[#allocation5 + $0x28] sm:$0xff]  ;;  %v44_v10 = vld [vmem:[#allocation2 + $0x8] sm:$0xff] }
  0x29   :  { %374 = vmatprep.subr.bf16.mxu0 %v373_v3  ;;  %370 = vmatprep.mubr.f32.mxu0 %v43_v6  ;;  %v61_v9 = vmul.f32 %v43_v6, %v43_v6  ;;  %v62_v11 = vmul.f32 %v44_v10, %v44_v10  ;;  %v381_v12 = vpack.c.bf16 %v50_v8, %v49_v7  ;;  %v51_v13 = vld [vmem:[#allocation5 + $0x30] sm:$0xff]  ;;  %v52_v14 = vld [vmem:[#allocation5 + $0x38] sm:$0xff]  ;;  %v53_v16 = vld [vmem:[#allocation5 + $0x40] sm:$0xff] }
  0x2a   :  { %376 = vmatpush3.bf16.xpose.msra.mxu0 %v373_v3  ;;  %v385_v15 = vpack.c.bf16 %v52_v14, %v51_v13  ;;  %v54_v17 = vld [vmem:[#allocation5 + $0x48] sm:$0xff]  ;;  %v55_v19 = vld [vmem:[#allocation5 + $0x50] sm:$0xff]  ;;  %v56_v20 = vld [vmem:[#allocation5 + $0x58] sm:$0xff] }
  0x2b   :  { %378 = vmatprep.subr.bf16.mxu0 %v377_v5  ;;  %63 = vadd.xlane.f32.xlu0 %v61_v9  ;;  %v389_v18 = vpack.c.bf16 %v54_v17, %v53_v16  ;;  %v393_v21 = vpack.c.bf16 %v56_v20, %v55_v19  ;;  %v57_v22 = vld [vmem:[#allocation5 + $0x60] sm:$0xff]  ;;  %v58_v23 = vld [vmem:[#allocation5 + $0x68] sm:$0xff]  ;;  %v59_v25 = vld [vmem:[#allocation5 + $0x70] sm:$0xff]  ;;  %v229_v20 = vlaneseq }
  0x2c   :  { %v397_v24 = vpack.c.bf16 %v58_v23, %v57_v22  ;;  %v60_v26 = vld [vmem:[#allocation5 + $0x78] sm:$0xff]  ;;  %v580_v28 = vld [vmem:[%s627_s2] sm:$0x1]  ;;  %s526_s2 = smov [#allocation7]  }
  0x2d   :  { %v401_v27 = vpack.c.bf16 %v60_v26, %v59_v25  ;;  %v223_v29 = vmul.f32 %v580_v28, %v580_v28  ;;  %v230_v22 = vshrl.u32 %v229_v20, 7  ;;  %s307_s11 = sshll.u32 %s526_s2, 4  ;;  %s308_s11 = int_to_ptr.vmem [resolvable:$true] %s307_s11 }
  0x2e   :  { %s494_s12 = scalar_lea.vmem %s308_s11, 256  ;;  %p499_p3 = scmp.lt.s32.totalorder %s308_s11, %s308_s11 }
  0x2f   :  { %65 = vadd.xlane.f32.xlu0 %v62_v11  ;;  %v225_v30 = vsel %vm224_vm0, %v223_v29, 0.0  ;;  %v231_v25 = vsub.s32 0, %v230_v22  ;;  %p495_p2 = scmp.ne.s32.totalorder %s308_s11, %s494_s12  ;;  %p500_p4 = scmp.lt.s32.totalorder %s494_s12, %s494_s12 }
  0x31   :  { %p501_p5 = por %p500_p4, %p499_p3 }
  0x32   :  { %380 = vmatpush3.bf16.xpose.msra.mxu0 %v377_v5 }
  0x33   :  { %382 = vmatprep.subr.bf16.mxu0 %v381_v12  ;;  %226 = vadd.xlane.f32.xlu0 %v225_v30  ;;  %p502_p6 = pnand %p501_p5, %p495_p2 }
  0x3a   :  { %384 = vmatpush3.bf16.xpose.msra.mxu0 %v381_v12 }
  0x3b   :  { %386 = vmatprep.subr.bf16.mxu0 %v385_v15 }
  0x42   :  { %388 = vmatpush3.bf16.xpose.msra.mxu0 %v385_v15 }
  0x43   :  { %390 = vmatprep.subr.bf16.mxu0 %v389_v18 }
  0x4a   :  { %392 = vmatpush3.bf16.xpose.msra.mxu0 %v389_v18 }
  0x4b   :  { %394 = vmatprep.subr.bf16.mxu0 %v393_v21 }
  0x52   :  { %396 = vmatpush3.bf16.xpose.msra.mxu0 %v393_v21 }
  0x53   :  { %398 = vmatprep.subr.bf16.mxu0 %v397_v24 }
  0x5a   :  { %400 = vmatpush3.bf16.xpose.msra.mxu0 %v397_v24 }
  0x5b   :  { %402 = vmatprep.subr.bf16.mxu0 %v401_v27 }
  0x62   :  { %404 = vmatpush3.bf16.xpose.msra.mxu0 %v401_v27 }
  0x69   :  { %371 = vmatmul.mubr.f32.vlgmr.msra.gmra.mrb[0].mxu0 %v44_v10 }
  0xb8   :  { %v64_v35 = vpop.xlane.xlu0 %63 }
  0xb9   :  { %410 = vrsqrt.f32 %v64_v35  ;;  %vm69_vm1 = vcmp.eq.f32.partialorder %v64_v35, inf  ;;  %v72_v40 = vand.u32 2147483648, %v64_v35  ;;  %vm71_vm2 = vcmp.eq.f32.partialorder %v64_v35, 0.0 }
  0xbc   :  { %v66_v36 = vpop.xlane.xlu0 %65 }
  0xbd   :  { %412 = vrsqrt.f32 %v66_v36  ;;  %vm76_vm3 = vcmp.eq.f32.partialorder %v66_v36, inf  ;;  %v79_v44 = vand.u32 2147483648, %v66_v36  ;;  %vm78_vm4 = vcmp.eq.f32.partialorder %v66_v36, 0.0 }
  0xc0   :  { %v227_v30 = vpop.xlane.xlu0 %226 }
  0xc3   :  { %v411_v37 = vpop.eup %410 }
  0xc4   :  { %v68_v38 = vmul.f32 %v411_v37, %v64_v35 }
  0xc6   :  { %v70_v41 = vsel %vm69_vm1, %v64_v35, %v68_v38  ;;  %v232_v35 = vrot.slane %v580_v28, %v231_v25 }
  0xc7   :  { %v413_v39 = vpop.eup %412  ;;  %v73_v43 = vsel %vm71_vm2, %v72_v40, %v70_v41 }
  0xc8   :  { %v75_v42 = vmul.f32 %v413_v39, %v66_v36  ;;  %v81_v46 = vmax.f32 %v73_v43, 1e-15  ;;  %v247_v39 = vrot.slane %v227_v30, %v231_v25 }
  0xca   :  { %v77_v45 = vsel %vm76_vm3, %v66_v36, %v75_v42  ;;  %v182_v48 = vmin.f32 %v81_v46, 0.9999999 }
  0xcb   :  { %v80_v47 = vsel %vm78_vm4, %v79_v44, %v77_v45 }
  0xcc   :  { %v82_v49 = vmax.f32 %v80_v47, 1e-15  ;;  %v186_v50 = vsub.f32 1.0, %v182_v48  ;;  %v184_v53 = vadd.f32 1.0, %v182_v48 }
  0xce   :  { %v183_v51 = vmin.f32 %v82_v49, 0.9999999  ;;  %414 = vrcp.f32 %v186_v50 }
  0xd0   :  { %v187_v52 = vsub.f32 1.0, %v183_v51  ;;  %v185_v55 = vadd.f32 1.0, %v183_v51 }
  0xd2   :  { %416 = vrcp.f32 %v187_v52 }
  0xd8   :  { %v415_v54 = vpop.eup %414 }
  0xd9   :  { %v189_v56 = vmul.f32 %v415_v54, %v184_v53 }
  0xdb   :  { %418 = vlog2.f32 %v189_v56 }
  0xdc   :  { %v417_v57 = vpop.eup %416 }
  0xdd   :  { %v191_v59 = vmul.f32 %v417_v57, %v185_v55 }
  0xe5   :  { %v419_v61 = vpop.eup %418 }
  0xe6   :  { %v193_v1 = vmul.f32 0.6931472, %v419_v61 }
  0xe8   :  { %v196_v9 = vmul.f32 0.5, %v193_v1 }
 0x13c   :  { %v584_v31 = vpop.f32.mrb[0].mxu0 }
 0x13d   :  { %v586_v32 = vpop.f32.mrb[1].mxu0  ;;  %v159_v34 = vmul.f32 %v584_v31, %v584_v31 }
 0x13e   :  { %v158_v33 = vmul.f32 %v586_v32, %v586_v32 }
 0x140   :  { %160 = vadd.xlane.f32.xlu1 %v158_v33 }
 0x144   :  { %162 = vadd.xlane.f32.xlu1 %v159_v34 }
 0x1cd   :  { %v161_v58 = vpop.xlane.xlu1 %160 }
 0x1ce   :  { %420 = vrsqrt.f32 %v161_v58  ;;  %vm168_vm5 = vcmp.eq.f32.partialorder %v161_v58, inf  ;;  %v171_v0 = vand.u32 2147483648, %v161_v58  ;;  %vm164_vm6 = vcmp.eq.f32.partialorder %v161_v58, 0.0 }
 0x1cf   :  { %422 = vlog2.f32 %v191_v59 }
 0x1d1   :  { %v592_v60 = vpop.xlane.xlu1 %162 }
 0x1d2   :  { %424 = vrsqrt.f32 %v592_v60  ;;  %vm175_vm7 = vcmp.eq.f32.partialorder %v592_v60, inf  ;;  %v178_v10 = vand.u32 2147483648, %v592_v60  ;;  %vm165_vm8 = vcmp.eq.f32.partialorder %v592_v60, 0.0 }
 0x1d3   :  { %426 = vrcp.f32 %v81_v46 }
 0x1d4   :  { %428 = vrcp.f32 %v82_v49 }
 0x1d8   :  { %v421_v62 = vpop.eup %420 }
 0x1d9   :  { %v167_v63 = vmul.f32 %v421_v62, %v161_v58  ;;  %v423_v2 = vpop.eup %422 }
 0x1da   :  { %v195_v13 = vmul.f32 0.6931472, %v423_v2 }
 0x1db   :  { %v169_v3 = vsel %vm168_vm5, %v161_v58, %v167_v63 }
 0x1dc   :  { %v425_v4 = vpop.eup %424  ;;  %v172_v5 = vsel %vm164_vm6, %v171_v0, %v169_v3  ;;  %v197_v18 = vmul.f32 0.5, %v195_v13 }
 0x1dd   :  { %v180_v6 = vmax.f32 %v172_v5, 1e-15  ;;  %v174_v7 = vmul.f32 %v425_v4, %v592_v60  ;;  %v427_v8 = vpop.eup %426 }
 0x1de   :  { %v429_v17 = vpop.eup %428 }
 0x1df   :  { %v199_v11 = vmul.f32 %v427_v8, %v180_v6  ;;  %v176_v12 = vsel %vm175_vm7, %v592_v60, %v174_v7  ;;  %430 = vrcp.f32 %v180_v6 }
 0x1e0   :  { %v179_v14 = vsel %vm165_vm8, %v178_v10, %v176_v12 }
 0x1e1   :  { %v202_v15 = vmul.f32 %v199_v11, %v196_v9  ;;  %v181_v16 = vmax.f32 %v179_v14, 1e-15 }
 0x1e3   :  { %432 = vtanh.f32 %v202_v15  ;;  %v201_v19 = vmul.f32 %v429_v17, %v181_v16 }
 0x1e4   :  { %434 = vrcp.f32 %v181_v16 }
 0x1e5   :  { %v203_v21 = vmul.f32 %v201_v19, %v197_v18 }
 0x1e7   :  { %436 = vtanh.f32 %v203_v21 }
 0x1e9   :  { %v431_v23 = vpop.eup %430 }
 0x1ea   :  { %v210_v27 = vmul.f32 0.996, %v431_v23 }
 0x1ed   :  { %v433_v24 = vpop.eup %432 }
 0x1ee   :  { %v207_v26 = vmul.f32 %v433_v24, %v431_v23  ;;  %v435_v29 = vpop.eup %434 }
 0x1ef   :  { %v211_v38 = vmul.f32 0.996, %v435_v29 }
 0x1f0   :  { %v212_v33 = vmin.f32 %v207_v26, %v210_v27 }
 0x1f1   :  { %v437_v34 = vpop.eup %436 }
 0x1f2   :  { %v214_v36 = vsel %vm164_vm6, 0.0, %v212_v33  ;;  %v209_v37 = vmul.f32 %v437_v34, %v435_v29 }
 0x1f3   :  { %v216_v40 = vmul.f32 %v214_v36, %v586_v32  ;;  %v219_v41 = vmul.f32 %v214_v36, %v214_v36 }
 0x1f4   :  { %v213_v42 = vmin.f32 %v209_v37, %v211_v38 }
 0x1f5   :  { %v234_v43 = vmul.f32 %v232_v35, %v216_v40  ;;  %v221_v44 = vmul.f32 %v219_v41, %v161_v58 }
 0x1f6   :  { %v215_v45 = vsel %vm165_vm8, 0.0, %v213_v42 }
 0x1f7   :  { %236 = vadd.xlane.f32.xlu1 %v234_v43  ;;  %v217_v46 = vmul.f32 %v584_v31, %v215_v45  ;;  %v220_v47 = vmul.f32 %v215_v45, %v215_v45  ;;  %v252_v48 = vsub.f32 1.0, %v221_v44  ;;  %v258_v28 = vmul.f32 %v247_v39, %v221_v44 }
 0x1f9   :  { %v235_v49 = vmul.f32 %v232_v35, %v217_v46  ;;  %v222_v50 = vmul.f32 %v220_v47, %v592_v60  ;;  %v254_v51 = vmul.f32 %v252_v48, %v232_v35 }
 0x1fb   :  { %238 = vadd.xlane.f32.xlu0 %v235_v49  ;;  %v253_v52 = vsub.f32 1.0, %v222_v50  ;;  %v259_v32 = vmul.f32 %v247_v39, %v222_v50 }
 0x1fd   :  { %v255_v53 = vmul.f32 %v253_v52, %v232_v35 }
 0x284   :  { %v237_v54 = vpop.xlane.xlu1 %236 }
 0x285   :  { %v240_v55 = vmul.f32 2.0, %v237_v54 }
 0x287   :  { %v242_v56 = vadd.f32 1.0, %v240_v55 }
 0x288   :  { %v239_v57 = vpop.xlane.xlu0 %238 }
 0x289   :  { %v248_v58 = vadd.f32 %v247_v39, %v242_v56  ;;  %v260_v59 = vadd.f32 %v258_v28, %v242_v56  ;;  %v241_v61 = vmul.f32 2.0, %v239_v57 }
 0x28b   :  { %v250_v62 = vmul.f32 %v248_v58, %v216_v40  ;;  %v262_v31 = vmax.f32 %v260_v59, 1e-15  ;;  %v243_v63 = vadd.f32 1.0, %v241_v61 }
 0x28d   :  { %438 = vrcp.f32 %v262_v31  ;;  %v249_v0 = vadd.f32 %v247_v39, %v243_v63  ;;  %v261_v1 = vadd.f32 %v259_v32, %v243_v63  ;;  %v256_v2 = vadd.f32 %v254_v51, %v250_v62 }
 0x28f   :  { %v251_v60 = vmul.f32 %v249_v0, %v217_v46  ;;  %v263_v3 = vmax.f32 %v261_v1, 1e-15 }
 0x291   :  { %440 = vrcp.f32 %v263_v3  ;;  %v257_v4 = vadd.f32 %v255_v53, %v251_v60 }
 0x297   :  { %v439_v5 = vpop.eup %438 }
 0x298   :  { %v268_v6 = vmul.f32 %v439_v5, %v256_v2 }
 0x29a   :  { %v270_v7 = vmul.f32 %v268_v6, %v268_v6 }
 0x29b   :  { %v441_v8 = vpop.eup %440 }
 0x29c   :  { %272 = vadd.xlane.f32.xlu1 %v270_v7  ;;  %v269_v9 = vmul.f32 %v441_v8, %v257_v4 }
 0x29e   :  { %v271_v10 = vmul.f32 %v269_v9, %v269_v9 }
 0x2a0   :  { %274 = vadd.xlane.f32.xlu0 %v271_v10 }
 0x329   :  { %v273_v11 = vpop.xlane.xlu1 %272 }
 0x32a   :  { %442 = vrsqrt.f32 %v273_v11  ;;  %vm278_vm9 = vcmp.eq.f32.partialorder %v273_v11, inf  ;;  %v281_v15 = vand.u32 2147483648, %v273_v11  ;;  %vm280_vm10 = vcmp.eq.f32.partialorder %v273_v11, 0.0 }
 0x32d   :  { %v275_v12 = vpop.xlane.xlu0 %274 }
 0x32e   :  { %444 = vrsqrt.f32 %v275_v12  ;;  %vm285_vm11 = vcmp.eq.f32.partialorder %v275_v12, inf  ;;  %v288_v21 = vand.u32 2147483648, %v275_v12  ;;  %vm287_vm12 = vcmp.eq.f32.partialorder %v275_v12, 0.0 }
 0x334   :  { %v443_v13 = vpop.eup %442 }
 0x335   :  { %v277_v14 = vmul.f32 %v443_v13, %v273_v11 }
 0x337   :  { %v279_v16 = vsel %vm278_vm9, %v273_v11, %v277_v14 }
 0x338   :  { %v445_v17 = vpop.eup %444  ;;  %v282_v18 = vsel %vm280_vm10, %v281_v15, %v279_v16 }
 0x339   :  { %v290_v19 = vmax.f32 %v282_v18, 1e-15  ;;  %v284_v20 = vmul.f32 %v445_v17, %v275_v12 }
 0x33b   :  { %v286_v22 = vsel %vm285_vm11, %v275_v12, %v284_v20  ;;  %446 = vrcp.f32 %v290_v19 }
 0x33c   :  { %v289_v23 = vsel %vm287_vm12, %v288_v21, %v286_v22 }
 0x33d   :  { %v291_v24 = vmax.f32 %v289_v23, 1e-15 }
 0x33f   :  { %448 = vrcp.f32 %v291_v24 }
 0x345   :  { %v447_v25 = vpop.eup %446 }
 0x346   :  { %v293_v26 = vmul.f32 0.996, %v447_v25 }
 0x348   :  { %v296_v27 = vmin.f32 %v293_v26, 1.0 }
 0x349   :  { %v449_v29 = vpop.eup %448 }
 0x34a   :  { %v295_v30 = vmul.f32 0.996, %v449_v29  ;;  %v298_v33 = vmul.f32 %v296_v27, %v268_v6 }
 0x34c   :  { %v297_v34 = vmin.f32 %v295_v30, 1.0  ;;  %300 = vst [vmem:[#allocation7] sm:$0xff] %v298_v33 }
 0x34e   :  { %v299_v35 = vmul.f32 %v297_v34, %v269_v9 }
 0x350   :  { %301 = vst [vmem:[#allocation7 + $0x8] sm:$0xff] %v299_v35 }
 0x351   :  { %505 = shalt.err (!%p502_p6)
}
 0x352   :  { %s506_s15 = scalar_lea.hbm %s628_s3, 256 }
 0x353   :  { %p507_p7 = scmp.ne.s32.totalorder %s628_s3, %s506_s15  ;;  %p510_p8 = scmp.lt.u32.totalorder %s506_s15, %s628_s3 }
 0x355   :  { %p512_p9 = pnand %p510_p8, %p507_p7 }
 0x357   :  { %515 = shalt.err (!%p512_p9)
}
 0x358   :  { %313 = dma.vmem_to_hbm [thread:$0]  %s308_s11, 256, %s628_s3, [#allocation4], %s523_s22, %s523_s22, %s524_s23  }
 0x359   :  { %520 = dma.done.wait [#allocation4], 256  }
 0x35a   :  { %521 = vsyncadd [#allocation4], 4294967040 }
 0x35b   :  { %317 = vsyncpa [#allocation3], 1 }
 0x35c   :  { %318 = vsyncpa [#allocation6], 1 }
 0x35d   :  { %319 = vsyncpa [#allocation4], 1 }

</bundles_post_ra>
